<compile_context>
chip_gen: v6e
topology: v6e:2x2x1
jax: 0.10.0
libtpu: 0.0.40
codegen_flags: <defaults>
</compile_context>

<pallas_src>
import functools
import math

import jax
import jax.numpy as jnp
from jax.experimental import pallas as pl
from jax.experimental.pallas import tpu as pltpu


def _round_up(x, m):
    return (x + m - 1) // m * m


def _neumf_kernel(n_fc_layers, u_mlp_ref, i_mlp_ref, u_mf_ref, i_mf_ref, *refs):
    """Transposed-layout NeuMF forward for one batch tile.

    Activations are kept (features, TILE_B) so the batch maps to the lane
    axis: matmuls are lane-wide on the MXU and the sigmoid / output store are
    lane-dense.

    refs = (w1u, w1i, b1, [wk, bk] * (n_fc_layers-1), wf_mlp, wf_mf, bf, out)
    """
    out_ref = refs[-1]
    p = refs[:-1]

    # GMF branch: elementwise product in f32 (v5e VPU has no bf16).
    mf_t = u_mf_ref[...].astype(jnp.float32) * i_mf_ref[...].astype(jnp.float32)

    # MLP branch, first layer: W1 @ concat([u; i]) == W1_u @ u + W1_i @ i.
    w1u, w1i, b1 = p[0][...], p[1][...], p[2][...]
    h = jnp.dot(w1u, u_mlp_ref[...], preferred_element_type=jnp.float32)
    h = h + jnp.dot(w1i, i_mlp_ref[...], preferred_element_type=jnp.float32)
    h = jnp.maximum(h + b1, 0.0)  # ReLU, f32

    idx = 3
    for _ in range(n_fc_layers - 1):
        wv, bv = p[idx][...], p[idx + 1][...]
        idx += 2
        h = jnp.dot(wv, h.astype(wv.dtype), preferred_element_type=jnp.float32)
        h = jnp.maximum(h + bv, 0.0)

    # Final Linear over concat([mlp, mf]) -> split weight; tiny M=1 dots, f32.
    wf_mlp, wf_mf, bf = p[idx][...], p[idx + 1][...], p[idx + 2][...]
    logits = (jnp.dot(wf_mlp, h, preferred_element_type=jnp.float32)
              + jnp.dot(wf_mf, mf_t, preferred_element_type=jnp.float32)
              + bf)
    out_ref[...] = jax.nn.sigmoid(logits)  # (1, TILE_B): lane-dense store


def init_params(key, config):
    """Deterministic init matching the PyTorch module (weights in (out, in))."""
    num_users = config["num_users"]
    num_items = config["num_items"]
    d_mlp = config["hidden_dim_mlp"]
    d_mf = config["hidden_dim_mf"]
    layers = config["layers"]
    assert layers[0] == 2 * d_mlp

    keys = jax.random.split(key, 16)
    ki = iter(keys)

    params = {}
    # Embeddings: N(0, 1) (PyTorch nn.Embedding default).
    params["emb_user_mlp"] = jax.random.normal(next(ki), (num_users, d_mlp), jnp.float32)
    params["emb_item_mlp"] = jax.random.normal(next(ki), (num_items, d_mlp), jnp.float32)
    params["emb_user_mf"] = jax.random.normal(next(ki), (num_users, d_mf), jnp.float32)
    params["emb_item_mf"] = jax.random.normal(next(ki), (num_items, d_mf), jnp.float32)

    def linear_init(k, in_f, out_f):
        k1, k2 = jax.random.split(k)
        bound = 1.0 / math.sqrt(in_f)
        w = jax.random.uniform(k1, (out_f, in_f), jnp.float32, -bound, bound)  # torch layout
        b = jax.random.uniform(k2, (out_f,), jnp.float32, -bound, bound)
        return w, b

    fc = []
    for in_f, out_f in zip(layers[:-1], layers[1:]):
        fc.append(linear_init(next(ki), in_f, out_f))
    params["fc"] = fc
    params["final"] = linear_init(next(ki), layers[-1] + d_mf, 1)
    return params


def neumf_forward(params, user_indices, item_indices, config, *, max_tile_b=512):
    d_mlp = config["hidden_dim_mlp"]
    d_mf = config["hidden_dim_mf"]
    layers = config["layers"]
    n_fc = len(layers) - 1
    B = user_indices.shape[0]

    # Batch tiling: TILE_B a multiple of 128 (lane width), up to max_tile_b.
    tile_b = min(max_tile_b, _round_up(B, 128))
    b_pad = _round_up(B, tile_b)
    n_tiles = b_pad // tile_b

    u_idx = jnp.pad(user_indices, (0, b_pad - B))
    i_idx = jnp.pad(item_indices, (0, b_pad - B))

    # TODO(synk): the embedding gather still runs in XLA and materializes the
    # gathered (D, B) activations in HBM; an in-kernel DMA gather (scalar
    # prefetch of the index tile + per-row async copies from tables kept in
    # pl.ANY) would remove that extra HBM round trip for huge tables.
    compute_dt = jnp.bfloat16

    def gather_t(table, idx):
        # Row gather (contiguous rows) then transpose to (D, B); XLA fuses.
        return jnp.take(table, idx, axis=0).astype(compute_dt).T

    u_mlp_t = gather_t(params["emb_user_mlp"], u_idx)
    i_mlp_t = gather_t(params["emb_item_mlp"], i_idx)
    u_mf_t = gather_t(params["emb_user_mf"], u_idx)
    i_mf_t = gather_t(params["emb_item_mf"], i_idx)

    # Weights stay in PyTorch (out, in) layout, which is exactly what the
    # transposed-layout kernel needs (y^T = W @ x^T).  Split W1 into user/item
    # halves and the final weight into MLP/MF halves (no in-kernel concat).
    w1, b1 = params["fc"][0]
    w1u = w1[:, :d_mlp].astype(compute_dt)
    w1i = w1[:, d_mlp:].astype(compute_dt)
    b1c = b1.reshape(-1, 1).astype(jnp.float32)
    wf, bf = params["final"]
    wf_mlp = wf[:, : layers[-1]].astype(jnp.float32)
    wf_mf = wf[:, layers[-1]:].astype(jnp.float32)
    bf_sc = bf.reshape(1, 1).astype(jnp.float32)

    kernel_inputs = [u_mlp_t, i_mlp_t, u_mf_t, i_mf_t, w1u, w1i, b1c]
    for w, b in params["fc"][1:]:
        kernel_inputs += [w.astype(compute_dt), b.reshape(-1, 1).astype(jnp.float32)]
    kernel_inputs += [wf_mlp, wf_mf, bf_sc]

    # Batch-streamed embedding inputs: one (D, tile_b) block per grid step.
    emb_specs = [
        pl.BlockSpec((d_mlp, tile_b), lambda i: (0, i)),
        pl.BlockSpec((d_mlp, tile_b), lambda i: (0, i)),
        pl.BlockSpec((d_mf, tile_b), lambda i: (0, i)),
        pl.BlockSpec((d_mf, tile_b), lambda i: (0, i)),
    ]
    # Weights/biases: constant index_map -> DMA'd once, resident across grid.
    weight_specs = [
        pl.BlockSpec(tuple(x.shape), lambda i: (0, 0)) for x in kernel_inputs[4:]
    ]

    # Advisory cost estimate so XLA can overlap the surrounding gathers.
    flops_per_row = 2 * (2 * d_mlp) * layers[1]
    for k in range(1, n_fc):
        flops_per_row += 2 * layers[k] * layers[k + 1]
    flops_per_row += 2 * (layers[-1] + d_mf) + d_mf
    weight_bytes = sum(int(x.size) * x.dtype.itemsize for x in kernel_inputs[4:])
    emb_bytes = b_pad * 2 * (d_mlp + d_mf) * 2  # bf16 embedding streams
    cost = pl.CostEstimate(
        flops=int(b_pad * flops_per_row),
        transcendentals=int(b_pad),
        bytes_accessed=int(emb_bytes + weight_bytes + 4 * b_pad),
    )

    kernel = functools.partial(_neumf_kernel, n_fc)
    out_t = pl.pallas_call(
        kernel,
        out_shape=jax.ShapeDtypeStruct((1, b_pad), jnp.float32),
        grid=(n_tiles,),
        in_specs=emb_specs + weight_specs,
        out_specs=pl.BlockSpec((1, tile_b), lambda i: (0, i)),
        compiler_params=pltpu.CompilerParams(
            dimension_semantics=("parallel",)),
        cost_estimate=cost,
    )(*kernel_inputs)

    return out_t[0, :B].reshape(B, 1)


def neumf_reference(params, user_indices, item_indices, config):
    """Pure-JAX f32 reference mirroring the PyTorch forward exactly."""
    u_mlp = jnp.take(params["emb_user_mlp"], user_indices, axis=0)
    i_mlp = jnp.take(params["emb_item_mlp"], item_indices, axis=0)
    u_mf = jnp.take(params["emb_user_mf"], user_indices, axis=0)
    i_mf = jnp.take(params["emb_item_mf"], item_indices, axis=0)

    mlp_vector = jnp.concatenate([u_mlp, i_mlp], axis=-1)
    mf_vector = u_mf * i_mf
    for w, b in params["fc"]:
        mlp_vector = jnp.maximum(mlp_vector @ w.T + b, 0.0)
    vector = jnp.concatenate([mlp_vector, mf_vector], axis=-1)
    wf, bf = params["final"]
    return jax.nn.sigmoid(vector @ wf.T + bf)


if __name__ == "__main__":
    config = {
        "num_users": 32,
        "num_items": 48,
        "hidden_dim_mlp": 32,
        "hidden_dim_mf": 16,
        "layers": [64, 32, 16],  # layers[0] must equal 2 * hidden_dim_mlp
    }

    key = jax.random.PRNGKey(0)
    k_params, k_user, k_item = jax.random.split(key, 3)
    params = init_params(k_params, config)

    batch = 8
    user_indices = jax.random.randint(k_user, (batch,), 0, config["num_users"], jnp.int32)
    item_indices = jax.random.randint(k_item, (batch,), 0, config["num_items"], jnp.int32)

    out = neumf_forward(params, user_indices, item_indices, config)
    out = jax.block_until_ready(out)

    ref = neumf_reference(params, user_indices, item_indices, config)
    assert out.shape == (batch, 1)
    # bf16 embedding/weight streams -> loosen tolerance vs the f32 reference
    # (sigmoid output is in [0, 1], so atol dominates and 3e-2 is generous).
    assert jnp.allclose(out, ref, atol=3e-2, rtol=3e-2), (out, ref)
    print("KERNEL_OK")
</pallas_src>

<mosaic_0001>
module attributes {stable_mosaic.version = 11 : i64} {
  func.func @_neumf_kernel(%arg0: i32, %arg1: memref<32x128xbf16, #tpu.memory_space<vmem>>, %arg2: memref<32x128xbf16, #tpu.memory_space<vmem>>, %arg3: memref<16x128xbf16, #tpu.memory_space<vmem>>, %arg4: memref<16x128xbf16, #tpu.memory_space<vmem>>, %arg5: memref<32x32xbf16, #tpu.memory_space<vmem>>, %arg6: memref<32x32xbf16, #tpu.memory_space<vmem>>, %arg7: memref<32x1xf32, #tpu.memory_space<vmem>>, %arg8: memref<16x32xbf16, #tpu.memory_space<vmem>>, %arg9: memref<16x1xf32, #tpu.memory_space<vmem>>, %arg10: memref<1x16xf32, #tpu.memory_space<vmem>>, %arg11: memref<1x16xf32, #tpu.memory_space<vmem>>, %arg12: memref<1x1xf32, #tpu.memory_space<vmem>>, %arg13: memref<1x128xf32, #tpu.memory_space<vmem>>) attributes {dimension_semantics = [#tpu.dimension_semantics<parallel>], iteration_bounds = array<i64: 1>, scalar_prefetch = 0 : i64, scratch_operands = 0 : i64, tpu.core_type = #tpu.core_type<tc>, window_params = [{transform_indices = @transform_0, window_bounds = array<i64: 32, 128>}, {transform_indices = @transform_1, window_bounds = array<i64: 32, 128>}, {transform_indices = @transform_2, window_bounds = array<i64: 16, 128>}, {transform_indices = @transform_3, window_bounds = array<i64: 16, 128>}, {pipeline_mode = #tpu.pipeline_mode<synchronous>, transform_indices = @transform_4, window_bounds = array<i64: 32, 32>}, {pipeline_mode = #tpu.pipeline_mode<synchronous>, transform_indices = @transform_5, window_bounds = array<i64: 32, 32>}, {pipeline_mode = #tpu.pipeline_mode<synchronous>, transform_indices = @transform_6, window_bounds = array<i64: 32, 1>}, {pipeline_mode = #tpu.pipeline_mode<synchronous>, transform_indices = @transform_7, window_bounds = array<i64: 16, 32>}, {pipeline_mode = #tpu.pipeline_mode<synchronous>, transform_indices = @transform_8, window_bounds = array<i64: 16, 1>}, {pipeline_mode = #tpu.pipeline_mode<synchronous>, transform_indices = @transform_9, window_bounds = array<i64: 1, 16>}, {pipeline_mode = #tpu.pipeline_mode<synchronous>, transform_indices = @transform_10, window_bounds = array<i64: 1, 16>}, {pipeline_mode = #tpu.pipeline_mode<synchronous>, transform_indices = @transform_11, window_bounds = array<i64: 1, 1>}, {transform_indices = @transform_12, window_bounds = array<i64: 1, 128>}]} {
    %c0 = arith.constant 0 : index
    %c0_0 = arith.constant 0 : index
    %0 = vector.load %arg3[%c0, %c0_0] : memref<16x128xbf16, #tpu.memory_space<vmem>>, vector<16x128xbf16>
    %1 = arith.extf %0 : vector<16x128xbf16> to vector<16x128xf32>
    %c0_1 = arith.constant 0 : index
    %c0_2 = arith.constant 0 : index
    %2 = vector.load %arg4[%c0_1, %c0_2] : memref<16x128xbf16, #tpu.memory_space<vmem>>, vector<16x128xbf16>
    %3 = arith.extf %2 : vector<16x128xbf16> to vector<16x128xf32>
    %4 = arith.mulf %1, %3 : vector<16x128xf32>
    %c0_3 = arith.constant 0 : index
    %c0_4 = arith.constant 0 : index
    %5 = vector.load %arg5[%c0_3, %c0_4] : memref<32x32xbf16, #tpu.memory_space<vmem>>, vector<32x32xbf16>
    %c0_5 = arith.constant 0 : index
    %c0_6 = arith.constant 0 : index
    %6 = vector.load %arg6[%c0_5, %c0_6] : memref<32x32xbf16, #tpu.memory_space<vmem>>, vector<32x32xbf16>
    %c0_7 = arith.constant 0 : index
    %c0_8 = arith.constant 0 : index
    %7 = vector.load %arg7[%c0_7, %c0_8] : memref<32x1xf32, #tpu.memory_space<vmem>>, vector<32x1xf32>
    %c0_9 = arith.constant 0 : index
    %c0_10 = arith.constant 0 : index
    %8 = vector.load %arg1[%c0_9, %c0_10] : memref<32x128xbf16, #tpu.memory_space<vmem>>, vector<32x128xbf16>
    %cst = arith.constant dense<0.000000e+00> : vector<32x128xf32>
    %9 = tpu.matmul %5, %8, %cst {dimension_numbers = #tpu.dot_dimension_numbers<[1], [0], [0], [1], [0, 0, 1, 1], [], []>} : vector<32x32xbf16>, vector<32x128xbf16>, vector<32x128xf32> -> vector<32x128xf32>
    %c0_11 = arith.constant 0 : index
    %c0_12 = arith.constant 0 : index
    %10 = vector.load %arg2[%c0_11, %c0_12] : memref<32x128xbf16, #tpu.memory_space<vmem>>, vector<32x128xbf16>
    %cst_13 = arith.constant dense<0.000000e+00> : vector<32x128xf32>
    %11 = tpu.matmul %6, %10, %cst_13 {dimension_numbers = #tpu.dot_dimension_numbers<[1], [0], [0], [1], [0, 0, 1, 1], [], []>} : vector<32x32xbf16>, vector<32x128xbf16>, vector<32x128xf32> -> vector<32x128xf32>
    %12 = arith.addf %9, %11 : vector<32x128xf32>
    %13 = vector.broadcast %7 : vector<32x1xf32> to vector<32x128xf32>
    %14 = arith.addf %12, %13 : vector<32x128xf32>
    %cst_14 = arith.constant 0.000000e+00 : f32
    %15 = vector.broadcast %cst_14 : f32 to vector<32x128xf32>
    %16 = arith.maximumf %14, %15 : vector<32x128xf32>
    %c0_15 = arith.constant 0 : index
    %c0_16 = arith.constant 0 : index
    %17 = vector.load %arg8[%c0_15, %c0_16] : memref<16x32xbf16, #tpu.memory_space<vmem>>, vector<16x32xbf16>
    %c0_17 = arith.constant 0 : index
    %c0_18 = arith.constant 0 : index
    %18 = vector.load %arg9[%c0_17, %c0_18] : memref<16x1xf32, #tpu.memory_space<vmem>>, vector<16x1xf32>
    %19 = arith.truncf %16 : vector<32x128xf32> to vector<32x128xbf16>
    %cst_19 = arith.constant dense<0.000000e+00> : vector<16x128xf32>
    %20 = tpu.matmul %17, %19, %cst_19 {dimension_numbers = #tpu.dot_dimension_numbers<[1], [0], [0], [1], [0, 0, 1, 1], [], []>} : vector<16x32xbf16>, vector<32x128xbf16>, vector<16x128xf32> -> vector<16x128xf32>
    %21 = vector.broadcast %18 : vector<16x1xf32> to vector<16x128xf32>
    %22 = arith.addf %20, %21 : vector<16x128xf32>
    %cst_20 = arith.constant 0.000000e+00 : f32
    %23 = vector.broadcast %cst_20 : f32 to vector<16x128xf32>
    %24 = arith.maximumf %22, %23 : vector<16x128xf32>
    %c0_21 = arith.constant 0 : index
    %c0_22 = arith.constant 0 : index
    %25 = vector.load %arg10[%c0_21, %c0_22] : memref<1x16xf32, #tpu.memory_space<vmem>>, vector<1x16xf32>
    %c0_23 = arith.constant 0 : index
    %c0_24 = arith.constant 0 : index
    %26 = vector.load %arg11[%c0_23, %c0_24] : memref<1x16xf32, #tpu.memory_space<vmem>>, vector<1x16xf32>
    %c0_25 = arith.constant 0 : index
    %c0_26 = arith.constant 0 : index
    %27 = vector.load %arg12[%c0_25, %c0_26] : memref<1x1xf32, #tpu.memory_space<vmem>>, vector<1x1xf32>
    %cst_27 = arith.constant dense<0.000000e+00> : vector<1x128xf32>
    %28 = tpu.matmul %25, %24, %cst_27 {dimension_numbers = #tpu.dot_dimension_numbers<[1], [0], [0], [1], [0, 0, 1, 1], [], []>} : vector<1x16xf32>, vector<16x128xf32>, vector<1x128xf32> -> vector<1x128xf32>
    %cst_28 = arith.constant dense<0.000000e+00> : vector<1x128xf32>
    %29 = tpu.matmul %26, %4, %cst_28 {dimension_numbers = #tpu.dot_dimension_numbers<[1], [0], [0], [1], [0, 0, 1, 1], [], []>} : vector<1x16xf32>, vector<16x128xf32>, vector<1x128xf32> -> vector<1x128xf32>
    %30 = arith.addf %28, %29 : vector<1x128xf32>
    %31 = vector.broadcast %27 : vector<1x1xf32> to vector<1x128xf32>
    %32 = arith.addf %30, %31 : vector<1x128xf32>
    %33 = arith.negf %32 : vector<1x128xf32>
    %34 = math.exp %33 : vector<1x128xf32>
    %cst_29 = arith.constant 1.000000e+00 : f32
    %35 = vector.broadcast %cst_29 : f32 to vector<1x128xf32>
    %36 = arith.addf %35, %34 : vector<1x128xf32>
    %37 = arith.divf %35, %36 : vector<1x128xf32>
    %c0_30 = arith.constant 0 : index
    %c0_31 = arith.constant 0 : index
    %38 = vector.load %arg13[%c0_30, %c0_31] : memref<1x128xf32, #tpu.memory_space<vmem>>, vector<1x128xf32>
    tpu.vector_store %arg13[%c0_30, %c0_31], %37 {strides = array<i32>} : memref<1x128xf32, #tpu.memory_space<vmem>>, vector<1x128xf32>,
    return
  }
  func.func @transform_0(%arg0: i32) -> (i32, i32) {
    %c0_i32 = arith.constant 0 : i32
    %c0_i32_0 = arith.constant 0 : i32
    return %c0_i32, %arg0 : i32, i32
  }
  func.func @transform_1(%arg0: i32) -> (i32, i32) {
    %c0_i32 = arith.constant 0 : i32
    %c0_i32_0 = arith.constant 0 : i32
    return %c0_i32, %arg0 : i32, i32
  }
  func.func @transform_2(%arg0: i32) -> (i32, i32) {
    %c0_i32 = arith.constant 0 : i32
    %c0_i32_0 = arith.constant 0 : i32
    return %c0_i32, %arg0 : i32, i32
  }
  func.func @transform_3(%arg0: i32) -> (i32, i32) {
    %c0_i32 = arith.constant 0 : i32
    %c0_i32_0 = arith.constant 0 : i32
    return %c0_i32, %arg0 : i32, i32
  }
  func.func @transform_4(%arg0: i32) -> (i32, i32) {
    %c0_i32 = arith.constant 0 : i32
    %c0_i32_0 = arith.constant 0 : i32
    %c0_i32_1 = arith.constant 0 : i32
    return %c0_i32, %c0_i32_0 : i32, i32
  }
  func.func @transform_5(%arg0: i32) -> (i32, i32) {
    %c0_i32 = arith.constant 0 : i32
    %c0_i32_0 = arith.constant 0 : i32
    %c0_i32_1 = arith.constant 0 : i32
    return %c0_i32, %c0_i32_0 : i32, i32
  }
  func.func @transform_6(%arg0: i32) -> (i32, i32) {
    %c0_i32 = arith.constant 0 : i32
    %c0_i32_0 = arith.constant 0 : i32
    %c0_i32_1 = arith.constant 0 : i32
    return %c0_i32, %c0_i32_0 : i32, i32
  }
  func.func @transform_7(%arg0: i32) -> (i32, i32) {
    %c0_i32 = arith.constant 0 : i32
    %c0_i32_0 = arith.constant 0 : i32
    %c0_i32_1 = arith.constant 0 : i32
    return %c0_i32, %c0_i32_0 : i32, i32
  }
  func.func @transform_8(%arg0: i32) -> (i32, i32) {
    %c0_i32 = arith.constant 0 : i32
    %c0_i32_0 = arith.constant 0 : i32
    %c0_i32_1 = arith.constant 0 : i32
    return %c0_i32, %c0_i32_0 : i32, i32
  }
  func.func @transform_9(%arg0: i32) -> (i32, i32) {
    %c0_i32 = arith.constant 0 : i32
    %c0_i32_0 = arith.constant 0 : i32
    %c0_i32_1 = arith.constant 0 : i32
    return %c0_i32, %c0_i32_0 : i32, i32
  }
  func.func @transform_10(%arg0: i32) -> (i32, i32) {
    %c0_i32 = arith.constant 0 : i32
    %c0_i32_0 = arith.constant 0 : i32
    %c0_i32_1 = arith.constant 0 : i32
    return %c0_i32, %c0_i32_0 : i32, i32
  }
  func.func @transform_11(%arg0: i32) -> (i32, i32) {
    %c0_i32 = arith.constant 0 : i32
    %c0_i32_0 = arith.constant 0 : i32
    %c0_i32_1 = arith.constant 0 : i32
    return %c0_i32, %c0_i32_0 : i32, i32
  }
  func.func @transform_12(%arg0: i32) -> (i32, i32) {
    %c0_i32 = arith.constant 0 : i32
    %c0_i32_0 = arith.constant 0 : i32
    return %c0_i32, %arg0 : i32, i32
  }
}

</mosaic_0001>

<bundles_post_ra>
// kernel: tpu_custom_call.1
= control target key start
LH: loop header
LB: loop body
LE: loop exit
PB: predicated region body
PF: predicated region fallthrough
CT: control target
= control target key end

     0   :  { %s857_s0 = inlined_call_operand.vmem [shape: bf16[32,128], index: 0, kind: input, shape index: {}]   ;;  %s858_s1 = inlined_call_operand.vmem [shape: bf16[32,128], index: 1, kind: input, shape index: {}]   ;;  %s859_s2 = inlined_call_operand.hbm [shape: bf16[16,128], index: 2, kind: input, shape index: {}]   ;;  %s860_s3 = inlined_call_operand.vmem [shape: bf16[16,128], index: 3, kind: input, shape index: {}]   ;;  %s861_s4 = inlined_call_operand.vmem [shape: bf16[32,32], index: 4, kind: input, shape index: {}]   ;;  %s862_s5 = inlined_call_operand.hbm [shape: bf16[32,32], index: 5, kind: input, shape index: {}]   ;;  %s863_s6 = inlined_call_operand.vmem [shape: f32[32,1], index: 6, kind: input, shape index: {}]   ;;  %s864_s7 = inlined_call_operand.vmem [shape: bf16[16,32], index: 7, kind: input, shape index: {}]   ;;  %s865_s8 = inlined_call_operand.vmem [shape: f32[16,1], index: 8, kind: input, shape index: {}]   ;;  %s866_s9 = inlined_call_operand.vmem [shape: f32[1,16], index: 9, kind: input, shape index: {}]   ;;  %s867_s10 = inlined_call_operand.vmem [shape: f32[1,16], index: 10, kind: input, shape index: {}]   ;;  %s868_s11 = inlined_call_operand.<no memory space> [shape: f32[1,1], index: 11, kind: input, shape index: {}]   ;;  %s869_s12 = inlined_call_operand.hbm [shape: f32[1,128], index: 12, kind: output, shape index: {}]  }
   0x1   :  { %v17_v0 = vstv %s868_s11 }
   0x2   :  { %18 = vst [vmem:[#allocation2] sm:$0x1] %v17_v0 }
   0x3   :  { %19 = vsyncpa [#allocation4], 0 }
   0x4   :  { %20 = vsyncpa [#allocation7], 0 }
   0x5   :  { %21 = vsyncpa [#allocation5], 0  ;;  %s705_s23 = smov [#allocation3]  }
   0x6   :  { %s31_s24 = sshll.u32 %s705_s23, 4  ;;  %s32_s24 = int_to_ptr.vmem [resolvable:$true] %s31_s24 }
   0x7   :  { %s647_s25 = scalar_lea.vmem %s32_s24, 128  ;;  %p652_p1 = scmp.lt.s32.totalorder %s32_s24, %s32_s24 }
   0x8   :  { %p648_p0 = scmp.ne.s32.totalorder %s32_s24, %s647_s25  ;;  %p653_p2 = scmp.lt.s32.totalorder %s647_s25, %s647_s25 }
   0xa   :  { %p654_p3 = por %p653_p2, %p652_p1 }
   0xc   :  { %p655_p4 = pnand %p654_p3, %p648_p0 }
   0xe   :  { %658 = shalt.err (!%p655_p4)
}
   0xf   :  { %s706_s26 = smov 64   ;;  %s707_s27 = smov 4  }
  0x10   :  { %37 = dma.hbm_to_vmem [thread:$0]  %s859_s2, 128, %s32_s24, [#allocation4], %s706_s26, %s706_s26, %s707_s27  }
  0x11   :  { %s708_s11 = smov [#allocation6]  }
  0x12   :  { %s47_s30 = sshll.u32 %s708_s11, 4  ;;  %s48_s30 = int_to_ptr.vmem [resolvable:$true] %s47_s30 }
  0x13   :  { %s667_s13 = scalar_lea.vmem %s48_s30, 256  ;;  %p672_p6 = scmp.lt.s32.totalorder %s48_s30, %s48_s30 }
  0x14   :  { %p668_p5 = scmp.ne.s32.totalorder %s48_s30, %s667_s13  ;;  %p673_p7 = scmp.lt.s32.totalorder %s667_s13, %s667_s13 }
  0x16   :  { %p674_p8 = por %p673_p7, %p672_p6 }
  0x18   :  { %p675_p9 = pnand %p674_p8, %p668_p5 }
  0x1a   :  { %678 = shalt.err (!%p675_p9)
}
  0x1b   :  { %53 = dma.hbm_to_vmem [thread:$0]  %s862_s5, 256, %s48_s30, [#allocation7], %s706_s26, %s706_s26, %s707_s27  }
  0x1c   :  { %699 = dma.done.wait [#allocation4], 128  }
  0x1d   :  { %700 = vsyncadd [#allocation4], 4294967168 }
  0x1e   :  { %701 = dma.done.wait [#allocation7], 256  }
  0x1f   :  { %702 = vsyncadd [#allocation7], 4294967040  ;;  %v709_v1 = vmov 0   ;;  %v626_v2 = vld [vmem:[%s858_s1 + $0x8] sm:$0xff]   ;;  %v628_v4 = vld [vmem:[%s858_s1] sm:$0xff]   ;;  %vm125_vm0 = vcmask 261120  }
  0x20   :  { %624 = vset.pattern.permute.xlu0 %v709_v1  ;;  %625 = vset.pattern.permute.xlu1 %v709_v1  ;;  %v627_v3 = vld [vmem:[%s857_s0 + $0x8] sm:$0xff]   ;;  %v629_v5 = vld [vmem:[%s857_s0] sm:$0xff]   ;;  %v632_v8 = vld [vmem:[#allocation6 + $0x8] sm:$0xff]   ;;  %v710_v17 = vmov 0.0   ;;  %vm711_vm1 = vmmov 0   ;;  %vm356_vm2 = vcmask 130048  }
  0x21   :  { %578 = vmatprep.subr.bf16.mxu0 %v626_v2  ;;  %586 = vmatprep.subr.bf16.mxu1 %v627_v3  ;;  %v630_v6 = vld [vmem:[#allocation6] sm:$0xff]   ;;  %v631_v7 = vld [vmem:[%s861_s4] sm:$0xff]   ;;  %v94_v12 = vld [vmem:[%s863_s6 + $0x18] sm:$0xff] }
  0x22   :  { %579 = vmatpush3.bf16.msra.mxu0 %v626_v2  ;;  %587 = vmatpush3.bf16.msra.mxu1 %v627_v3  ;;  %v633_v9 = vld [vmem:[%s861_s4 + $0x8] sm:$0xff]   ;;  %v93_v10 = vld [vmem:[%s863_s6 + $0x10] sm:$0xff]  ;;  %v91_v11 = vld [vmem:[%s863_s6] sm:$0xff]  ;;  %v508_v3 = vlaneseq }
  0x23   :  { %580 = vmatprep.subr.bf16.mxu0 %v628_v4  ;;  %588 = vmatprep.subr.bf16.mxu1 %v629_v5  ;;  %v92_v13 = vld [vmem:[%s863_s6 + $0x8] sm:$0xff]  ;;  %v288_v15 = vld [vmem:[%s865_s8] sm:$0xff] }
  0x24   :  { %582 = vmatprep.mubr.msk.bf16.mxu0 %vm125_vm0, %v630_v6  ;;  %590 = vmatprep.mubr.msk.bf16.mxu1 %vm125_vm0, %v631_v7  ;;  %v289_v14 = vld [vmem:[%s865_s8 + $0x8] sm:$0xff]  ;;  %v355_v16 = vld [vmem:[#allocation2] sm:$0x1] }
  0x25   :  { %270 = vperm.xlu0 %624, %v93_v10   ;;  %260 = vperm.xlu1 %625, %v91_v11   ;;  %v634_v44 = vld [vmem:[%s864_s7] sm:$0xff]  }
  0x26   :  { %581 = vmatpush3.bf16.msra.mxu0 %v628_v4  ;;  %589 = vmatpush3.bf16.msra.mxu1 %v629_v5  ;;  %v554_v45 = vld [vmem:[#allocation3] sm:$0xff]   ;;  %v354_v53 = vld [vmem:[%s867_s10] sm:$0x1]  ;;  %v509_v4 = vshrl.u32 %v508_v3, 7 }
  0x27   :  { %594 = vmatprep.subr.bf16.mxu0 %v710_v17  ;;  %602 = vmatprep.subr.mxu1 %v710_v17  ;;  %v558_v46 = vld [vmem:[%s860_s3] sm:$0xff]   ;;  %v556_v47 = vunpack.c.h.bf16 %v554_v45  ;;  %v555_v50 = vunpack.c.l.bf16 %v554_v45 }
  0x28   :  { %v560_v48 = vunpack.c.h.bf16 %v558_v46  ;;  %v559_v51 = vunpack.c.l.bf16 %v558_v46  ;;  %v353_v0 = vld [vmem:[%s866_s9] sm:$0x1]  ;;  %v510_v5 = vsub.s32 0, %v509_v4  ;;  %s712_s9 = smov [#allocation8]  }
  0x29   :  { %583 = vmatmul.mubr.msk.bf16.vlgmr.msra.gmra.mxu0 %vm125_vm0, %v632_v8  ;;  %591 = vmatmul.mubr.msk.bf16.vlgmr.msra.gmra.mxu1 %vm125_vm0, %v633_v9  ;;  %s526_s18 = sshll.u32 %s712_s9, 4  ;;  %s527_s18 = int_to_ptr.vmem [resolvable:$true] %s526_s18 }
  0x2a   :  { %275 = vperm.xlu0 %624, %v94_v12   ;;  %265 = vperm.xlu1 %625, %v92_v13   ;;  %v82_v49 = vmul.f32 %v560_v48, %v556_v47  ;;  %v81_v52 = vmul.f32 %v559_v51, %v555_v50  ;;  %s679_s19 = scalar_lea.vmem %s527_s18, 16  ;;  %s683_s20 = scalar_lea.vmem %s527_s18, 32 }
  0x2b   :  { %598 = vmatprep.mubr.msk.bf16.mxu0 %vm711_vm1, %v710_v17  ;;  %606 = vmatprep.mubr.msk.f32.mxu1 %vm711_vm1, %v710_v17  ;;  %p680_p10 = scmp.ne.s32.totalorder %s527_s18, %s679_s19  ;;  %p684_p11 = scmp.lt.s32.totalorder %s527_s18, %s527_s18 }
  0x2c   :  { %603 = vmatpush3.msra.mxu1 %v82_v49  ;;  %p685_p12 = scmp.lt.s32.totalorder %s683_s20, %s679_s19 }
  0x2d   :  { %604 = vmatprep.subr.mxu1 %v710_v17 }
  0x2e   :  { %299 = vperm.xlu0 %624, %v289_v14   ;;  %294 = vperm.xlu1 %625, %v288_v15   ;;  %p686_p13 = por %p685_p12, %p684_p11 }
  0x2f   :  { %605 = vmatpush3.msra.mxu1 %v81_v52 }
  0x30   :  { %609 = vmatprep.subr.mxu1 %v710_v17  ;;  %p687_p0 = pnand %p686_p13, %p680_p10 }
  0x31   :  { %607 = vmatmul.mubr.msk.f32.vlgmr.msra.gmra.mxu1 %vm356_vm2, %v354_v53 }
  0x32   :  { %505 = vperm.xlu0 %624, %v355_v16   ;;  %613 = vmatprep.mubr.msk.f32.mxu1 %vm711_vm1, %v710_v17 }
  0xa0   :  { %v271_v19 = vpop.permute.xlu0 %270  ;;  %v261_v23 = vpop.permute.xlu1 %260 }
  0xa5   :  { %v276_v31 = vpop.permute.xlu0 %275  ;;  %v266_v35 = vpop.permute.xlu1 %265 }
  0xa9   :  { %v300_v56 = vpop.permute.xlu0 %299  ;;  %v295_v57 = vpop.permute.xlu1 %294 }
  0xad   :  { %v506_v6 = vpop.permute.xlu0 %505 }
  0xae   :  { %v511_v8 = vrot.slane %v506_v6, %v510_v5 }
  0xe9   :  { %v584_v18 = vpop.f32.mrf.mxu0  ;;  %v592_v20 = vpop.f32.mrf.mxu1 }
  0xea   :  { %v252_v21 = vadd.f32 %v592_v20, %v584_v18 }
  0xeb   :  { %v166_v22 = vpop.f32.mrf.mxu0  ;;  %v243_v24 = vpop.f32.mrf.mxu1 }
  0xec   :  { %v280_v27 = vadd.f32 %v271_v19, %v252_v21  ;;  %v244_v28 = vadd.f32 %v243_v24, %v166_v22 }
  0xed   :  { %v585_v25 = vpop.f32.mrf.mxu0  ;;  %v593_v26 = vpop.f32.mrf.mxu1 }
  0xee   :  { %v255_v29 = vadd.f32 %v593_v26, %v585_v25  ;;  %v284_v36 = vmax.f32 %v280_v27, 0.0  ;;  %v278_v37 = vadd.f32 %v261_v23, %v244_v28 }
  0xef   :  { %v169_v30 = vpop.f32.mrf.mxu0  ;;  %v246_v32 = vpop.f32.mrf.mxu1 }
  0xf0   :  { %v281_v33 = vadd.f32 %v276_v31, %v255_v29  ;;  %v247_v34 = vadd.f32 %v246_v32, %v169_v30  ;;  %v282_v42 = vmax.f32 %v278_v37, 0.0 }
  0xf1   :  { %v426_v1 = vpop.f32.mrf.mxu1 }
  0xf2   :  { %v285_v38 = vmax.f32 %v281_v33, 0.0  ;;  %v279_v39 = vadd.f32 %v266_v35, %v247_v34 }
  0xf3   :  { %v608_v2 = vpop.f32.mrf.mxu1 }
  0xf4   :  { %v291_v40 = vpack.c.bf16 %v285_v38, %v284_v36  ;;  %v283_v41 = vmax.f32 %v279_v39, 0.0 }
  0xf6   :  { %595 = vmatpush3.bf16.msra.mxu0 %v291_v40  ;;  %v290_v43 = vpack.c.bf16 %v283_v41, %v282_v42 }
  0xf7   :  { %596 = vmatprep.subr.bf16.mxu0 %v710_v17 }
  0xfa   :  { %597 = vmatpush3.bf16.msra.mxu0 %v290_v43 }
  0xfd   :  { %599 = vmatmul.mubr.msk.bf16.vlgmr.msra.gmra.mxu0 %vm125_vm0, %v634_v44 }
 0x1bd   :  { %v344_v54 = vpop.f32.mrf.mxu0 }
 0x1be   :  { %v345_v59 = vadd.f32 %v344_v54, %v295_v57 }
 0x1bf   :  { %v600_v55 = vpop.f32.mrf.mxu0 }
 0x1c0   :  { %v351_v63 = vmax.f32 %v345_v59, 0.0 }
 0x1c1   :  { %v347_v58 = vpop.f32.mrf.mxu0 }
 0x1c2   :  { %v348_v60 = vadd.f32 %v347_v58, %v300_v56 }
 0x1c3   :  { %v601_v61 = vpop.f32.mrf.mxu0 }
 0x1c4   :  { %v352_v62 = vmax.f32 %v348_v60, 0.0 }
 0x1c6   :  { %610 = vmatpush3.msra.mxu1 %v352_v62 }
 0x1c7   :  { %611 = vmatprep.subr.mxu1 %v710_v17 }
 0x1c8   :  { %612 = vmatpush3.msra.mxu1 %v351_v63 }
 0x1c9   :  { %614 = vmatmul.mubr.msk.f32.vlgmr.msra.gmra.mxu1 %vm356_vm2, %v353_v0 }
 0x289   :  { %v499_v7 = vpop.f32.mrf.mxu1 }
 0x28a   :  { %v500_v9 = vadd.f32 %v499_v7, %v426_v1 }
 0x28b   :  { %v615_v10 = vpop.f32.mrf.mxu1 }
 0x28c   :  { %v512_v11 = vadd.f32 %v511_v8, %v500_v9 }
 0x28e   :  { %v552_v12 = vmul.f32 -1.442695, %v512_v11 }
 0x290   :  { %635 = vpow2.f32 %v552_v12 }
 0x29d   :  { %v636_v13 = vpop.eup %635 }
 0x29e   :  { %v516_v14 = vadd.f32 1.0, %v636_v13 }
 0x2a0   :  { %637 = vrcp.f32 %v516_v14 }
 0x2ad   :  { %v638_v15 = vpop.eup %637 }
 0x2ae   :  { %519 = vst [vmem:[#allocation8] sm:$0x1] %v638_v15 }
 0x2af   :  { %690 = shalt.err (!%p687_p0)
}
 0x2b0   :  { %529 = dma.vmem_to_hbm [thread:$0]  %s527_s18, 16, %s869_s12, [#allocation5]  }
 0x2b1   :  { %703 = dma.done.wait [#allocation5], 16  }
 0x2b2   :  { %704 = vsyncadd [#allocation5], 4294967280 }
 0x2b3   :  { %533 = vsyncpa [#allocation4], 1 }
 0x2b4   :  { %534 = vsyncpa [#allocation7], 1 }
 0x2b5   :  { %535 = vsyncpa [#allocation5], 1 }

</bundles_post_ra>
